<compile_context>
chip_gen: v7x
topology: tpu7x:2x2x1
jax: 0.10.0
libtpu: 0.0.40
codegen_flags: <defaults>
</compile_context>

<pallas_src>
import functools

import jax
import jax.numpy as jnp
from jax.experimental import pallas as pl
from jax.experimental.pallas import tpu as pltpu


def _round_up(x, m):
    return (x + m - 1) // m * m


def _gen_budget():
    """(target_tile_bytes, vmem_limit_bytes), generation-aware."""
    vmem = None
    try:
        vmem = getattr(pltpu.get_tpu_info(), "vmem_capacity_bytes", None)
    except Exception:
        vmem = None
    if vmem is None:
        vmem = 64 << 20                      # assume the smallest VMEM (v7x)
    if vmem >= (96 << 20):                   # v5e / v6e: 128 MiB physical VMEM
        return 16 << 20, 64 << 20
    return 12 << 20, 48 << 20                # v7x: 64 MiB physical VMEM


def channel_selection_kernel(x_ref, w1t_ref, w2t_ref, o_ref, sum_ref, max_ref,
                             *, hw_true, hw_tile, n_hw_steps):
    """One (batch-tile, hw-tile) grid step.

    x_ref:   (b_tile, c, hw_tile)   input block (one batch tile x one hw tile)
    w1t_ref: (c, cr)                transposed Conv1x1 #1 weight
    w2t_ref: (cr, c)                transposed Conv1x1 #2 weight
    o_ref:   (b_tile, c)            output block, resident across the hw axis
    sum_ref: (b_tile, c, 128) f32   lane-resident running sum
    max_ref: (b_tile, c, 128) f32   lane-resident running max
    """
    k = pl.program_id(1)
    last = n_hw_steps - 1
    n_chunks = hw_tile // 128

    @pl.when(k == 0)
    def _init():
        sum_ref[...] = jnp.zeros_like(sum_ref)
        max_ref[...] = jnp.full_like(max_ref, -jnp.inf)

    def accum_full(lo, hi):
        """Accumulate chunks [lo, hi): every lane is real data, no masks."""
        if hi <= lo:
            return
        if hi - lo <= 16:
            for j in range(lo, hi):          # static, fully unrolled
                xc = x_ref[:, :, j * 128:(j + 1) * 128].astype(jnp.float32)
                sum_ref[...] += xc
                max_ref[...] = jnp.maximum(max_ref[...], xc)
        else:
            def body(j, carry):
                start = pl.multiple_of(j * 128, 128)
                xc = x_ref[:, :, pl.ds(start, 128)].astype(jnp.float32)
                sum_ref[...] += xc
                max_ref[...] = jnp.maximum(max_ref[...], xc)
                return carry
            jax.lax.fori_loop(lo, hi, body, 0, unroll=8)

    def accum_partial(j, n_valid):
        """Chunk j (static) whose first n_valid (<128) lanes are real data."""
        xc = x_ref[:, :, j * 128:(j + 1) * 128].astype(jnp.float32)
        lane = jax.lax.broadcasted_iota(jnp.int32, xc.shape, 2)
        ok = lane < n_valid
        sum_ref[...] += jnp.where(ok, xc, 0.0)
        max_ref[...] = jnp.maximum(max_ref[...], jnp.where(ok, xc, -jnp.inf))

    # Steady-state hw tiles: no padding anywhere, no masks, pure VALU updates.
    if n_hw_steps > 1:
        @pl.when(k < last)
        def _steady():
            accum_full(0, n_chunks)

    # Last hw tile: mask only the one statically-known partial chunk; chunks
    # that are entirely padding are skipped.
    rem = hw_true - last * hw_tile           # real elements in the last tile
    full_valid = rem // 128
    tail = rem - full_valid * 128

    @pl.when(k == last)
    def _last():
        accum_full(0, full_valid)
        if tail:
            accum_partial(full_valid, tail)

        # ---- finalize: single cross-lane reduce + fused batched FC ---------
        bt = sum_ref.shape[0]
        avg = jnp.sum(sum_ref[...], axis=-1) * (1.0 / float(hw_true))   # (bt, c)
        mx = jnp.max(max_ref[...], axis=-1)                             # (bt, c)

        # Stack avg & max rows so the shared MLP runs as one matmul pair.
        p = jnp.concatenate([avg, mx], axis=0)                          # (2*bt, c)
        hid = jnp.maximum(
            jnp.dot(p, w1t_ref[...].astype(jnp.float32),
                    preferred_element_type=jnp.float32), 0.0)
        out = jnp.dot(hid, w2t_ref[...].astype(jnp.float32),
                      preferred_element_type=jnp.float32)
        v = out[:bt] + out[bt:]                                         # (bt, c)
        o_ref[...] = jax.nn.sigmoid(v).astype(o_ref.dtype)


def channel_selection(x, w1, w2, *, target_tile_bytes=None, vmem_limit_bytes=None):
    """x: (b, c, h, w) NCHW. w1: (c//r, c), w2: (c, c//r). Returns (b, c, 1, 1)."""
    b, c, h, w = x.shape
    cr = w1.shape[0]
    hw = h * w
    dtype = x.dtype
    itemsize = jnp.dtype(dtype).itemsize

    auto_tile, auto_vmem = _gen_budget()
    if target_tile_bytes is None:
        target_tile_bytes = auto_tile
    if vmem_limit_bytes is None:
        vmem_limit_bytes = auto_vmem

    hw_pad128 = _round_up(hw, 128)
    n_chunks_total = hw_pad128 // 128

    # ---- batch tile ---------------------------------------------------------
    # Budget for the two lane-resident f32 accumulators of (b_tile, c, 128).
    max_bt_acc = max(1, (8 << 20) // (2 * c * 128 * 4))
    if b <= 8:
        b_tile = b                            # block == full batch dim
    else:
        min_run = min(hw_pad128, 512 if itemsize >= 4 else 1024)
        per_b = c * min_run * itemsize
        want = max(8, target_tile_bytes // per_b)
        b_tile = int(min(64, b, max_bt_acc, want))
        b_tile = max(8, (b_tile // 8) * 8)    # multiple of 8 (sublane-aligned)
        if b >= 16:
            # keep >= 2 batch grid steps so both v7x TensorCores get work
            half = max(8, ((_round_up(b, 16) // 2) // 8) * 8)
            b_tile = min(b_tile, half)
    b_pad = _round_up(b, b_tile)

    # ---- hw tile: multiple of 128 lanes, >= 2 KiB contiguous run per row ----
    bytes_per_chunk = b_tile * c * 128 * itemsize
    min_chunks = min(n_chunks_total, 8 if itemsize <= 2 else 4)
    chunks = max(min_chunks,
                 min(n_chunks_total, max(1, target_tile_bytes // bytes_per_chunk)))

    def _footprint(chs):
        return (2 * b_tile * c * chs * 128 * itemsize      # double-buffered input
                + 2 * b_tile * c * 128 * 4                 # sum/max accumulators
                + 2 * b_tile * c * itemsize                # output block
                + 4 * c * cr * 4)                          # weights

    while chunks > 1 and _footprint(chunks) > int(0.85 * vmem_limit_bytes):
        chunks = max(1, chunks // 2)

    hw_tile = chunks * 128
    hw_pad = _round_up(hw, hw_tile)
    n_hw_steps = hw_pad // hw_tile

    # ---- host-side layout prep ----------------------------------------------
    x_flat = x.reshape(b, c, hw)
    if b_pad != b or hw_pad != hw:
        x_flat = jnp.pad(x_flat, ((0, b_pad - b), (0, 0), (0, hw_pad - hw)))

    w1t = jnp.asarray(w1).T     # (c, cr), native dtype
    w2t = jnp.asarray(w2).T     # (cr, c), native dtype

    grid = (b_pad // b_tile, n_hw_steps)

    kernel = functools.partial(
        channel_selection_kernel,
        hw_true=hw, hw_tile=hw_tile, n_hw_steps=n_hw_steps)

    out = pl.pallas_call(
        kernel,
        out_shape=jax.ShapeDtypeStruct((b_pad, c), dtype),
        grid_spec=pltpu.PrefetchScalarGridSpec(
            num_scalar_prefetch=0,
            grid=grid,
            in_specs=[
                pl.BlockSpec((b_tile, c, hw_tile), lambda i, k: (i, 0, k)),
                pl.BlockSpec((c, cr), lambda i, k: (0, 0)),
                pl.BlockSpec((cr, c), lambda i, k: (0, 0)),
            ],
            out_specs=pl.BlockSpec((b_tile, c), lambda i, k: (i, 0)),
            scratch_shapes=[
                pltpu.VMEM((b_tile, c, 128), jnp.float32),   # lane-resident sum
                pltpu.VMEM((b_tile, c, 128), jnp.float32),   # lane-resident max
            ],
        ),
        compiler_params=pltpu.CompilerParams(
            dimension_semantics=("parallel", "arbitrary"),
            vmem_limit_bytes=int(vmem_limit_bytes),
        ),
    )(x_flat, w1t, w2t)

    return out[:b].reshape(b, c, 1, 1)


def channel_selection_ref(x, w1, w2):
    """Pure-JAX reference matching the PyTorch module."""
    b, c, h, w = x.shape
    avg = jnp.mean(x, axis=(2, 3))   # (b, c)
    mx = jnp.max(x, axis=(2, 3))     # (b, c)

    def fc(p):
        hid = jnp.maximum(p @ w1.T, 0.0)   # (b, c//r)
        return hid @ w2.T                  # (b, c)

    v = jax.nn.sigmoid(fc(avg) + fc(mx))
    return v.reshape(b, c, 1, 1)


if __name__ == "__main__":
    key = jax.random.PRNGKey(0)
    kx1, kx2, kx3, k1, k2 = jax.random.split(key, 5)
    ratio = 8

    # ---- test 1: small shapes, single grid step -----------------------------
    b, c, h, w = 2, 16, 16, 16
    r_c = c // ratio
    x = jax.random.normal(kx1, (b, c, h, w), dtype=jnp.float32)
    w1 = jax.random.normal(k1, (r_c, c), dtype=jnp.float32) * (c ** -0.5)
    w2 = jax.random.normal(k2, (c, r_c), dtype=jnp.float32) * (r_c ** -0.5)

    out = jax.block_until_ready(channel_selection(x, w1, w2))
    ref = channel_selection_ref(x, w1, w2)
    assert out.shape == (b, c, 1, 1)
    err = float(jnp.max(jnp.abs(out - ref)))
    assert err < 1e-5, f"test1 max err {err}"

    # ---- test 2: force hw tiling + accumulation + tail-chunk masking --------
    h2, w2s = 40, 40   # hw = 1600 -> 4 hw tiles of 512, last tile masked
    x2 = jax.random.normal(kx2, (b, c, h2, w2s), dtype=jnp.float32)
    out2 = jax.block_until_ready(
        channel_selection(x2, w1, w2, target_tile_bytes=16 * 1024))
    ref2 = channel_selection_ref(x2, w1, w2)
    assert out2.shape == (b, c, 1, 1)
    err2 = float(jnp.max(jnp.abs(out2 - ref2)))
    assert err2 < 1e-5, f"test2 max err {err2}"

    # ---- test 3: b > 8 path (8-row batch tiles, 2 parallel batch steps),
    #              hw < 128 (single masked chunk) -----------------------------
    b3, c3, h3, w3 = 16, 32, 8, 8
    r_c3 = c3 // ratio
    x3 = jax.random.normal(kx3, (b3, c3, h3, w3), dtype=jnp.float32)
    w1_3 = jax.random.normal(k1, (r_c3, c3), dtype=jnp.float32) * (c3 ** -0.5)
    w2_3 = jax.random.normal(k2, (c3, r_c3), dtype=jnp.float32) * (r_c3 ** -0.5)
    out3 = jax.block_until_ready(channel_selection(x3, w1_3, w2_3))
    ref3 = channel_selection_ref(x3, w1_3, w2_3)
    assert out3.shape == (b3, c3, 1, 1)
    err3 = float(jnp.max(jnp.abs(out3 - ref3)))
    assert err3 < 1e-5, f"test3 max err {err3}"

    print("KERNEL_OK")
</pallas_src>

<mosaic_0001>
module attributes {stable_mosaic.version = 11 : i64} {
  func.func @channel_selection_kernel(%arg0: i32, %arg1: i32, %arg2: memref<2x16x256xf32, #tpu.memory_space<vmem>>, %arg3: memref<16x2xf32, #tpu.memory_space<vmem>>, %arg4: memref<2x16xf32, #tpu.memory_space<vmem>>, %arg5: memref<2x16xf32, #tpu.memory_space<vmem>>, %arg6: memref<2x16x128xf32, #tpu.memory_space<vmem>>, %arg7: memref<2x16x128xf32, #tpu.memory_space<vmem>>) attributes {dimension_semantics = [#tpu.dimension_semantics<parallel>, #tpu.dimension_semantics<arbitrary>], iteration_bounds = array<i64: 1, 1>, scalar_prefetch = 0 : i64, scratch_operands = 2 : i64, tpu.core_type = #tpu.core_type<tc>, window_params = [{transform_indices = @transform_0, window_bounds = array<i64: 2, 16, 256>}, {pipeline_mode = #tpu.pipeline_mode<synchronous>, transform_indices = @transform_1, window_bounds = array<i64: 16, 2>}, {pipeline_mode = #tpu.pipeline_mode<synchronous>, transform_indices = @transform_2, window_bounds = array<i64: 2, 16>}, {transform_indices = @transform_3, window_bounds = array<i64: 2, 16>}]} {
    %c0_i32 = arith.constant 0 : i32
    %0 = arith.cmpi eq, %arg1, %c0_i32 : i32
    %1 = arith.extui %0 : i1 to i32
    %c0_i32_0 = arith.constant 0 : i32
    %2 = arith.cmpi ne, %1, %c0_i32_0 : i32
    scf.if %2 {
      %cst = arith.constant 0.000000e+00 : f32
      %6 = vector.broadcast %cst : f32 to vector<2x16x128xf32>
      %c0 = arith.constant 0 : index
      %c0_3 = arith.constant 0 : index
      %c0_4 = arith.constant 0 : index
      %7 = vector.load %arg6[%c0, %c0_3, %c0_4] : memref<2x16x128xf32, #tpu.memory_space<vmem>>, vector<2x16x128xf32>
      tpu.vector_store %arg6[%c0, %c0_3, %c0_4], %6 {strides = array<i32>} : memref<2x16x128xf32, #tpu.memory_space<vmem>>, vector<2x16x128xf32>,
      %cst_5 = arith.constant 0xFF800000 : f32
      %8 = vector.broadcast %cst_5 : f32 to vector<2x16x128xf32>
      %c0_6 = arith.constant 0 : index
      %c0_7 = arith.constant 0 : index
      %c0_8 = arith.constant 0 : index
      %9 = vector.load %arg7[%c0_6, %c0_7, %c0_8] : memref<2x16x128xf32, #tpu.memory_space<vmem>>, vector<2x16x128xf32>
      tpu.vector_store %arg7[%c0_6, %c0_7, %c0_8], %8 {strides = array<i32>} : memref<2x16x128xf32, #tpu.memory_space<vmem>>, vector<2x16x128xf32>,
    } else {
    }
    %c0_i32_1 = arith.constant 0 : i32
    %3 = arith.cmpi eq, %arg1, %c0_i32_1 : i32
    %4 = arith.extui %3 : i1 to i32
    %c0_i32_2 = arith.constant 0 : i32
    %5 = arith.cmpi ne, %4, %c0_i32_2 : i32
    scf.if %5 {
      %c0 = arith.constant 0 : index
      %c0_3 = arith.constant 0 : index
      %c0_4 = arith.constant 0 : index
      %6 = vector.load %arg2[%c0, %c0_3, %c0_4] : memref<2x16x256xf32, #tpu.memory_space<vmem>>, vector<2x16x128xf32>
      %c0_5 = arith.constant 0 : index
      %c0_6 = arith.constant 0 : index
      %c0_7 = arith.constant 0 : index
      %7 = vector.load %arg6[%c0_5, %c0_6, %c0_7] : memref<2x16x128xf32, #tpu.memory_space<vmem>>, vector<2x16x128xf32>
      %8 = arith.addf %7, %6 : vector<2x16x128xf32>
      %c0_8 = arith.constant 0 : index
      %c0_9 = arith.constant 0 : index
      %c0_10 = arith.constant 0 : index
      %9 = vector.load %arg6[%c0_8, %c0_9, %c0_10] : memref<2x16x128xf32, #tpu.memory_space<vmem>>, vector<2x16x128xf32>
      tpu.vector_store %arg6[%c0_8, %c0_9, %c0_10], %8 {strides = array<i32>} : memref<2x16x128xf32, #tpu.memory_space<vmem>>, vector<2x16x128xf32>,
      %c0_11 = arith.constant 0 : index
      %c0_12 = arith.constant 0 : index
      %c0_13 = arith.constant 0 : index
      %10 = vector.load %arg7[%c0_11, %c0_12, %c0_13] : memref<2x16x128xf32, #tpu.memory_space<vmem>>, vector<2x16x128xf32>
      %11 = arith.maximumf %10, %6 : vector<2x16x128xf32>
      %c0_14 = arith.constant 0 : index
      %c0_15 = arith.constant 0 : index
      %c0_16 = arith.constant 0 : index
      %12 = vector.load %arg7[%c0_14, %c0_15, %c0_16] : memref<2x16x128xf32, #tpu.memory_space<vmem>>, vector<2x16x128xf32>
      tpu.vector_store %arg7[%c0_14, %c0_15, %c0_16], %11 {strides = array<i32>} : memref<2x16x128xf32, #tpu.memory_space<vmem>>, vector<2x16x128xf32>,
      %c0_17 = arith.constant 0 : index
      %c0_18 = arith.constant 0 : index
      %c128 = arith.constant 128 : index
      %13 = vector.load %arg2[%c0_17, %c0_18, %c128] : memref<2x16x256xf32, #tpu.memory_space<vmem>>, vector<2x16x128xf32>
      %c0_19 = arith.constant 0 : index
      %c0_20 = arith.constant 0 : index
      %c0_21 = arith.constant 0 : index
      %14 = vector.load %arg6[%c0_19, %c0_20, %c0_21] : memref<2x16x128xf32, #tpu.memory_space<vmem>>, vector<2x16x128xf32>
      %15 = arith.addf %14, %13 : vector<2x16x128xf32>
      %c0_22 = arith.constant 0 : index
      %c0_23 = arith.constant 0 : index
      %c0_24 = arith.constant 0 : index
      %16 = vector.load %arg6[%c0_22, %c0_23, %c0_24] : memref<2x16x128xf32, #tpu.memory_space<vmem>>, vector<2x16x128xf32>
      tpu.vector_store %arg6[%c0_22, %c0_23, %c0_24], %15 {strides = array<i32>} : memref<2x16x128xf32, #tpu.memory_space<vmem>>, vector<2x16x128xf32>,
      %c0_25 = arith.constant 0 : index
      %c0_26 = arith.constant 0 : index
      %c0_27 = arith.constant 0 : index
      %17 = vector.load %arg7[%c0_25, %c0_26, %c0_27] : memref<2x16x128xf32, #tpu.memory_space<vmem>>, vector<2x16x128xf32>
      %18 = arith.maximumf %17, %13 : vector<2x16x128xf32>
      %c0_28 = arith.constant 0 : index
      %c0_29 = arith.constant 0 : index
      %c0_30 = arith.constant 0 : index
      %19 = vector.load %arg7[%c0_28, %c0_29, %c0_30] : memref<2x16x128xf32, #tpu.memory_space<vmem>>, vector<2x16x128xf32>
      tpu.vector_store %arg7[%c0_28, %c0_29, %c0_30], %18 {strides = array<i32>} : memref<2x16x128xf32, #tpu.memory_space<vmem>>, vector<2x16x128xf32>,
      %c0_31 = arith.constant 0 : index
      %c0_32 = arith.constant 0 : index
      %c0_33 = arith.constant 0 : index
      %20 = vector.load %arg6[%c0_31, %c0_32, %c0_33] : memref<2x16x128xf32, #tpu.memory_space<vmem>>, vector<2x16x128xf32>
      %cst = arith.constant dense<0.000000e+00> : vector<2x16xf32>
      %21 = vector.multi_reduction <add>, %20, %cst [2] : vector<2x16x128xf32> to vector<2x16xf32>
      %cst_34 = arith.constant 3.906250e-03 : f32
      %22 = vector.broadcast %cst_34 : f32 to vector<2x16xf32>
      %23 = arith.mulf %21, %22 : vector<2x16xf32>
      %c0_35 = arith.constant 0 : index
      %c0_36 = arith.constant 0 : index
      %c0_37 = arith.constant 0 : index
      %24 = vector.load %arg7[%c0_35, %c0_36, %c0_37] : memref<2x16x128xf32, #tpu.memory_space<vmem>>, vector<2x16x128xf32>
      %cst_38 = arith.constant dense<0xFF800000> : vector<2x16xf32>
      %25 = vector.multi_reduction <maximumf>, %24, %cst_38 [2] : vector<2x16x128xf32> to vector<2x16xf32>
      %26 = tpu.concatenate %23, %25 in 0 : vector<2x16xf32>, vector<2x16xf32> -> vector<4x16xf32>
      %c0_39 = arith.constant 0 : index
      %c0_40 = arith.constant 0 : index
      %27 = vector.load %arg3[%c0_39, %c0_40] : memref<16x2xf32, #tpu.memory_space<vmem>>, vector<16x2xf32>
      %cst_41 = arith.constant dense<0.000000e+00> : vector<4x2xf32>
      %28 = tpu.matmul %26, %27, %cst_41 {dimension_numbers = #tpu.dot_dimension_numbers<[1], [0], [0], [1], [0, 0, 1, 1], [], []>} : vector<4x16xf32>, vector<16x2xf32>, vector<4x2xf32> -> vector<4x2xf32>
      %cst_42 = arith.constant 0.000000e+00 : f32
      %29 = vector.broadcast %cst_42 : f32 to vector<4x2xf32>
      %30 = arith.maximumf %28, %29 : vector<4x2xf32>
      %c0_43 = arith.constant 0 : index
      %c0_44 = arith.constant 0 : index
      %31 = vector.load %arg4[%c0_43, %c0_44] : memref<2x16xf32, #tpu.memory_space<vmem>>, vector<2x16xf32>
      %cst_45 = arith.constant dense<0.000000e+00> : vector<4x16xf32>
      %32 = tpu.matmul %30, %31, %cst_45 {dimension_numbers = #tpu.dot_dimension_numbers<[1], [0], [0], [1], [0, 0, 1, 1], [], []>} : vector<4x2xf32>, vector<2x16xf32>, vector<4x16xf32> -> vector<4x16xf32>
      %33 = vector.extract_strided_slice %32 {offsets = [0, 0], sizes = [2, 16], strides = [1, 1]} : vector<4x16xf32> to vector<2x16xf32>
      %34 = vector.extract_strided_slice %32 {offsets = [2, 0], sizes = [2, 16], strides = [1, 1]} : vector<4x16xf32> to vector<2x16xf32>
      %35 = arith.addf %33, %34 : vector<2x16xf32>
      %36 = arith.negf %35 : vector<2x16xf32>
      %37 = math.exp %36 : vector<2x16xf32>
      %cst_46 = arith.constant 1.000000e+00 : f32
      %38 = vector.broadcast %cst_46 : f32 to vector<2x16xf32>
      %39 = arith.addf %38, %37 : vector<2x16xf32>
      %40 = arith.divf %38, %39 : vector<2x16xf32>
      %c0_47 = arith.constant 0 : index
      %c0_48 = arith.constant 0 : index
      %41 = vector.load %arg5[%c0_47, %c0_48] : memref<2x16xf32, #tpu.memory_space<vmem>>, vector<2x16xf32>
      tpu.vector_store %arg5[%c0_47, %c0_48], %40 {strides = array<i32>} : memref<2x16xf32, #tpu.memory_space<vmem>>, vector<2x16xf32>,
    } else {
    }
    return
  }
  func.func @transform_0(%arg0: i32, %arg1: i32) -> (i32, i32, i32) {
    %c0_i32 = arith.constant 0 : i32
    %c0_i32_0 = arith.constant 0 : i32
    return %arg0, %c0_i32, %arg1 : i32, i32, i32
  }
  func.func @transform_1(%arg0: i32, %arg1: i32) -> (i32, i32) {
    %c0_i32 = arith.constant 0 : i32
    %c0_i32_0 = arith.constant 0 : i32
    %c0_i32_1 = arith.constant 0 : i32
    return %c0_i32, %c0_i32_0 : i32, i32
  }
  func.func @transform_2(%arg0: i32, %arg1: i32) -> (i32, i32) {
    %c0_i32 = arith.constant 0 : i32
    %c0_i32_0 = arith.constant 0 : i32
    %c0_i32_1 = arith.constant 0 : i32
    return %c0_i32, %c0_i32_0 : i32, i32
  }
  func.func @transform_3(%arg0: i32, %arg1: i32) -> (i32, i32) {
    %c0_i32 = arith.constant 0 : i32
    %c0_i32_0 = arith.constant 0 : i32
    return %arg0, %c0_i32 : i32, i32
  }
}

</mosaic_0001>

<bundles_post_ra>
// kernel: tpu_custom_call.1
= control target key start
LH: loop header
LB: loop body
LE: loop exit
PB: predicated region body
PF: predicated region fallthrough
CT: control target
= control target key end

     0   :  { %8 = vsyncpa [#allocation5], 0  ;;  %s506_s0 = inlined_call_operand.hbm [shape: f32[2,16,256], index: 0, kind: input, shape index: {}]   ;;  %s507_s1 = inlined_call_operand.vmem [shape: f32[16,2], index: 1, kind: input, shape index: {}]   ;;  %s508_s2 = inlined_call_operand.vmem [shape: f32[2,16], index: 2, kind: input, shape index: {}]   ;;  %s509_s3 = inlined_call_operand.hbm [shape: f32[2,16], index: 3, kind: output, shape index: {}]  }
   0x1   :  { %9 = vsyncpa [#allocation6], 0  ;;  %s446_s12 = smov [#allocation4]   ;;  %s398_s16 = scalar_lea.hbm %s506_s0, 1024 }
   0x2   :  { %s15_s13 = sshll.u32 %s446_s12, 4  ;;  %p399_p0 = scmp.ne.s32.totalorder %s506_s0, %s398_s16  ;;  %s16_s13 = int_to_ptr.vmem [resolvable:$true] %s15_s13 }
   0x3   :  { %p402_p1 = scmp.lt.u32.totalorder %s398_s16, %s506_s0 }
   0x5   :  { %p404_p2 = pnand %p402_p1, %p399_p0 }
   0x7   :  { %407 = shalt.err (!%p404_p2)
}
   0x8   :  { %s408_s21 = scalar_lea.vmem %s16_s13, 1024  ;;  %p413_p4 = scmp.lt.s32.totalorder %s16_s13, %s16_s13 }
   0x9   :  { %p409_p3 = scmp.ne.s32.totalorder %s16_s13, %s408_s21  ;;  %p414_p5 = scmp.lt.s32.totalorder %s408_s21, %s408_s21 }
   0xb   :  { %p415_p6 = por %p414_p5, %p413_p4 }
   0xd   :  { %p416_p7 = pnand %p415_p6, %p409_p3 }
   0xf   :  { %419 = shalt.err (!%p416_p7)
}
  0x10   :  { %s447_s22 = smov 256   ;;  %s448_s23 = smov 16  }
  0x11   :  { %21 = dma.hbm_to_vmem [thread:$0]  %s506_s0, 1024, %s16_s13, [#allocation5], %s447_s22, %s447_s22, %s448_s23  }
  0x12   :  { %442 = dma.done.wait [#allocation5], 1024  }
  0x13   :  { %443 = vsyncadd [#allocation5], 4294966272  ;;  %v43_v0 = vld [vmem:[#allocation4 + $0x20] sm:$0xff]  ;;  %v71_v1 = vld [vmem:[#allocation4 + $0x28] sm:$0xff]  ;;  %v449_v19 = vmov 0.0|0.0   ;;  %vm450_vm0 = vmmov 0   ;;  %v129_v21 = vlaneseq }
  0x14   :  { %v41_v2 = vld [vmem:[#allocation4] sm:$0xff]  ;;  %v79_v3 = vadd.f32 %v71_v1, %v43_v0  ;;  %v69_v4 = vld [vmem:[#allocation4 + $0x8] sm:$0xff]  ;;  %v44_v5 = vld [vmem:[#allocation4 + $0x30] sm:$0xff]  ;;  %v91_v15 = vmax.f32 %v43_v0, %v71_v1  ;;  %384 = vmatprep.subr.bf16.mxu0 %v449_v19  ;;  %v451_v20 = vmov 0.0   ;;  %vm140_vm1 = vcmask 130112   ;;  %s452_s30 = smov [#allocation7]  }
  0x15   :  { %v72_v6 = vld [vmem:[#allocation4 + $0x38] sm:$0xff]  ;;  %v77_v7 = vadd.f32 %v69_v4, %v41_v2  ;;  %v42_v8 = vld [vmem:[#allocation4 + $0x10] sm:$0xff]  ;;  %v89_v13 = vmax.f32 %v41_v2, %v69_v4  ;;  %v181_v16 = vld [vmem:[%s507_s1] sm:$0xff]  ;;  %376 = vmatprep.mubr.msk.f32.mxu0 %vm450_vm0, %v451_v20  ;;  %379 = vmatprep.subr.mxu1 %v451_v20  ;;  %v130_v22 = vand.u32 127, %v129_v21  ;;  %v132_v26 = vshrl.u32 %v129_v21, 7  ;;  %s354_s4 = sshll.u32 %s452_s30, 4  ;;  %s355_s4 = int_to_ptr.vmem [resolvable:$true] %s354_s4 }
  0x16   :  { %v70_v9 = vld [vmem:[#allocation4 + $0x18] sm:$0xff]  ;;  %105 = vadd.xlane.f32.xlu1 %v79_v3  ;;  %v80_v10 = vadd.f32 %v72_v6, %v44_v5  ;;  %v92_v14 = vmax.f32 %v44_v5, %v72_v6  ;;  %v182_v17 = vld [vmem:[%s507_s1 + $0x8] sm:$0xff]  ;;  %381 = vmatprep.mubr.msk.f32.mxu1 %vm450_vm0, %v451_v20  ;;  %vm151_vm2 = vcmask 1041409   ;;  %vm176_vm3 = vcmask 1043459   ;;  %v258_v54 = vld [vmem:[%s508_s2] sm:$0x3]  ;;  %p425_p9 = scmp.lt.s32.totalorder %s355_s4, %s355_s4 }
  0x17   :  { %101 = vadd.xlane.f32.xlu0 %v77_v7  ;;  %v78_v11 = vadd.f32 %v70_v9, %v42_v8  ;;  %v90_v12 = vmax.f32 %v42_v8, %v70_v9  ;;  %v385_v18 = vpack.c.bf16 %v182_v17, %v181_v16  ;;  %v135_v25 = vadd.s32 4294967288, %v130_v22  ;;  %s420_s2 = scalar_lea.vmem %s355_s4, 32 }
  0x18   :  { %v133_v32 = vsub.s32 %v130_v22, %v132_v26  ;;  %vm179_vm4 = vcmask 1041408   ;;  %vm183_vm5 = vcmask 130048   ;;  %vm259_vm6 = vcmask 15360   ;;  %p421_p8 = scmp.ne.s32.totalorder %s355_s4, %s420_s2  ;;  %p426_p10 = scmp.lt.s32.totalorder %s420_s2, %s420_s2 }
  0x19   :  { %386 = vmatpush3.bf16.msra.mxu0 %v385_v18  ;;  %v138_v29 = vsub.s32 %v135_v25, %v132_v26  ;;  %380 = vmatpush3.msk.msra.mxu1 %vm179_vm4, %v258_v54  ;;  %vm346_vm7 = vcmask 123904  }
  0x1a   :  { %107 = vadd.xlane.f32.xlu1 %v80_v10  ;;  %p427_p11 = por %p426_p10, %p425_p9 }
  0x1b   :  { %103 = vadd.xlane.f32.xlu0 %v78_v11 }
  0x1c   :  { %p428_p12 = pnand %p427_p11, %p421_p8 }
  0x1e   :  { %119 = vmax.xlane.f32.xlu1 %v90_v12 }
  0x1f   :  { %117 = vmax.xlane.f32.xlu0 %v89_v13 }
  0x22   :  { %123 = vmax.xlane.f32.xlu1 %v92_v14 }
  0x23   :  { %121 = vmax.xlane.f32.xlu0 %v91_v15 }
  0xa3   :  { %v106_v23 = vpop.xlane.xlu1 %105 }
  0xa4   :  { %v102_v24 = vpop.xlane.xlu0 %101  ;;  %v111_v33 = vmul.f32 0.00390625, %v106_v23 }
  0xa5   :  { %v109_v34 = vmul.f32 0.00390625, %v102_v24 }
  0xa6   :  { %v145_v39 = vrot.slane %v111_v33, %v133_v32 }
  0xa7   :  { %v108_v27 = vpop.xlane.xlu1 %107  ;;  %v134_v40 = vrot.slane %v109_v34, %v133_v32 }
  0xa8   :  { %v104_v28 = vpop.xlane.xlu0 %103  ;;  %v112_v30 = vmul.f32 0.00390625, %v108_v27 }
  0xa9   :  { %v110_v31 = vmul.f32 0.00390625, %v104_v28 }
  0xaa   :  { %v149_v37 = vrot.slane %v112_v30, %v138_v29 }
  0xab   :  { %v120_v35 = vpop.xlane.xlu1 %119  ;;  %v139_v38 = vrot.slane %v110_v31, %v138_v29 }
  0xac   :  { %v118_v36 = vpop.xlane.xlu0 %117  ;;  %v165_v41 = vrot.slane %v120_v35, %v138_v29  ;;  %v150_v46 = vsel %vm140_vm1, %v149_v37, %v145_v39 }
  0xad   :  { %v161_v42 = vrot.slane %v118_v36, %v133_v32  ;;  %v141_v47 = vsel %vm140_vm1, %v139_v38, %v134_v40 }
  0xae   :  { %v152_v51 = vsel %vm151_vm2, %v150_v46, %v141_v47 }
  0xaf   :  { %v124_v43 = vpop.xlane.xlu1 %123  ;;  %v166_v49 = vsel %vm140_vm1, %v165_v41, %v161_v42 }
  0xb0   :  { %v174_v44 = vrot.slane %v124_v43, %v138_v29  ;;  %v122_v45 = vpop.xlane.xlu0 %121 }
  0xb1   :  { %v170_v48 = vrot.slane %v122_v45, %v133_v32 }
  0xb3   :  { %v175_v50 = vsel %vm140_vm1, %v174_v44, %v170_v48 }
  0xb4   :  { %v177_v52 = vsel %vm176_vm3, %v175_v50, %v166_v49 }
  0xb5   :  { %v180_v53 = vsel %vm179_vm4, %v152_v51, %v177_v52 }
  0xb6   :  { %377 = vmatmul.mubr.msk.f32.vlgmr.msra.gmra.mrb[0].mxu0 %vm183_vm5, %v180_v53 }
 0x189   :  { %v253_v55 = vpop.f32.mrb[0].mxu0 }
 0x18a   :  { %v257_v56 = vmax.f32 %v253_v55, 0.0  ;;  %v378_v57 = vpop.f32.mrb[1].mxu0 }
 0x18c   :  { %382 = vmatmul.mubr.msk.f32.vlgmr.msra.gmra.mrb[0].mxu1 %vm259_vm6, %v257_v56 }
 0x25f   :  { %v332_v58 = vpop.f32.mrb[0].mxu1 }
 0x260   :  { %v337_v59 = vrot.slane %v332_v58, 2  ;;  %v383_v60 = vpop.f32.mrb[1].mxu1 }
 0x262   :  { %v339_v61 = vadd.f32 %v337_v59, %v332_v58 }
 0x264   :  { %v366_v62 = vmul.f32 -1.442695, %v339_v61 }
 0x266   :  { %394 = vpow2.f32 %v366_v62 }
 0x270   :  { %v395_v63 = vpop.eup %394 }
 0x271   :  { %v343_v0 = vadd.f32 1.0, %v395_v63 }
 0x273   :  { %396 = vrcp.f32 %v343_v0 }
 0x27d   :  { %v397_v1 = vpop.eup %396 }
 0x27e   :  { %347 = vst.msk [vmem:[#allocation7] sm:$0x3] %vm346_vm7, %v397_v1 }
 0x27f   :  { %431 = shalt.err (!%p428_p12)
}
 0x280   :  { %s432_s7 = scalar_lea.hbm %s509_s3, 32 }
 0x281   :  { %p433_p13 = scmp.ne.s32.totalorder %s509_s3, %s432_s7  ;;  %p436_p0 = scmp.lt.u32.totalorder %s432_s7, %s509_s3 }
 0x283   :  { %p438_p1 = pnand %p436_p0, %p433_p13 }
 0x285   :  { %441 = shalt.err (!%p438_p1)
}
 0x286   :  { %357 = dma.vmem_to_hbm [thread:$0]  %s355_s4, 32, %s509_s3, [#allocation6]  }
 0x287   :  { %444 = dma.done.wait [#allocation6], 32  }
 0x288   :  { %445 = vsyncadd [#allocation6], 4294967264 }
 0x289   :  { %361 = vsyncpa [#allocation5], 1 }
 0x28a   :  { %362 = vsyncpa [#allocation6], 1 }

</bundles_post_ra>
